<compile_context>
chip_gen: v5e
topology: v5e:2x2
jax: 0.10.0
libtpu: 0.0.40
codegen_flags: <defaults>
</compile_context>

<pallas_src>
import functools

import jax
import jax.numpy as jnp
from jax.experimental import pallas as pl
from jax.experimental.pallas import tpu as pltpu


# ---------------------------------------------------------------------------
# Path A: whole planes, P planes per grid step.
# ---------------------------------------------------------------------------
def _pad_planes_kernel(x_ref, o_ref, *, src_h, src_w, out_h, out_w, pad_value):
    """Pads P whole planes: (P, src_h, src_w) -> (P, out_h, out_w).

    Every output element is written exactly once:
      - top-left (src_h, src_w) region  <- source data
      - right strip  [:src_h, src_w:]   <- pad value   (if any width pad)
      - bottom strip [src_h:, :]        <- pad value   (if any height pad)
    """
    p = o_ref.shape[0]

    o_ref[:, :src_h, :src_w] = x_ref[...]

    if out_w > src_w:
        o_ref[:, :src_h, src_w:] = jnp.full(
            (p, src_h, out_w - src_w), pad_value, dtype=o_ref.dtype
        )

    if out_h > src_h:
        o_ref[:, src_h:, :] = jnp.full(
            (p, out_h - src_h, out_w), pad_value, dtype=o_ref.dtype
        )


def _choose_plane_batch(n_planes, src_h, src_w, out_h, out_w, dtype, budget):
    """Largest plane batch P that keeps double-buffered blocks within budget."""
    itemsize = jnp.dtype(dtype).itemsize
    per_plane = (src_h * src_w + out_h * out_w) * itemsize
    max_p = max(1, budget // per_plane)

    # Keep >= 2 grid steps when possible (megacore sharding on v7x) and balance
    # block sizes across steps.
    min_steps = 2 if n_planes >= 2 else 1
    steps = max(min_steps, -(-n_planes // max_p))  # ceil div
    p = -(-n_planes // steps)                      # ceil div
    return int(min(p, n_planes))


# ---------------------------------------------------------------------------
# Path B: one plane per step, output rows tiled in sublane-aligned blocks.
# ---------------------------------------------------------------------------
def _pad_rows_kernel(x_ref, o_ref, *, src_h, src_w, out_w, tile_h, pad_value):
    """Pads one row-block of one plane: (1, tile_h, src_w) -> (1, tile_h, out_w).

    The block's absolute output rows are [row0, row0 + tile_h).  Rows >= src_h
    (pure pad region, incl. the straddling block's tail) are selected to the
    pad value with a VPU `where`; the input block index is clamped in the
    BlockSpec so those rows never read past the source plane.
    """
    row0 = pl.program_id(1) * tile_h
    rows = row0 + jax.lax.broadcasted_iota(jnp.int32, (tile_h, 1), 0)
    valid = rows < src_h                                     # (tile_h, 1)

    fill_left = jnp.full(x_ref.shape, pad_value, dtype=o_ref.dtype)
    o_ref[:, :, :src_w] = jnp.where(valid[None, :, :], x_ref[...], fill_left)

    if out_w > src_w:
        o_ref[:, :, src_w:] = jnp.full(
            (o_ref.shape[0], tile_h, out_w - src_w), pad_value, dtype=o_ref.dtype
        )


def _choose_row_tile(src_h, src_w, out_w, dtype, budget):
    """Row-block height: multiple of 8, within budget, within the source plane."""
    itemsize = jnp.dtype(dtype).itemsize
    per_row = (src_w + out_w) * itemsize
    t = max(8, (budget // per_row) // 8 * 8)
    t = min(t, (src_h // 8) * 8)
    return int(max(8, t))


# ---------------------------------------------------------------------------
# Wrapper
# ---------------------------------------------------------------------------
def batch_fixed_size_pad(inputs, size, img_pad_value=0,
                         max_block_bytes=12 * 1024 * 1024):
    """Pallas implementation of BatchFixedSizePad.forward (image branch).

    Args:
      inputs: jnp array of shape (N, C, H, W).
      size: (dst_h, dst_w) fixed padding size.
      img_pad_value: constant fill value for padded pixels.
      max_block_bytes: VMEM budget per (input block + output block) set;
        doubled by pipelining double-buffering.

    Returns:
      (N, C, max(H, dst_h), max(W, dst_w)) padded array, or `inputs`
      unchanged if it is already at least as large as `size`.
    """
    dst_h, dst_w = size
    n, c, src_h, src_w = inputs.shape

    # Early return mirrors the PyTorch module exactly.
    if src_h >= dst_h and src_w >= dst_w:
        return inputs

    out_h = max(src_h, dst_h)
    out_w = max(src_w, dst_w)

    n_planes = n * c
    x = inputs.reshape(n_planes, src_h, src_w)
    itemsize = jnp.dtype(inputs.dtype).itemsize
    plane_pair_bytes = (src_h * src_w + out_h * out_w) * itemsize

    compiler_kwargs = dict(vmem_limit_bytes=48 * 1024 * 1024)

    if plane_pair_bytes <= max_block_bytes or src_h < 8:
        # -------- Path A: whole planes, P per grid step. --------
        p = _choose_plane_batch(
            n_planes, src_h, src_w, out_h, out_w, inputs.dtype, max_block_bytes
        )
        kernel = functools.partial(
            _pad_planes_kernel,
            src_h=src_h, src_w=src_w, out_h=out_h, out_w=out_w,
            pad_value=img_pad_value,
        )
        out = pl.pallas_call(
            kernel,
            out_shape=jax.ShapeDtypeStruct((n_planes, out_h, out_w), inputs.dtype),
            grid=(pl.cdiv(n_planes, p),),
            in_specs=[pl.BlockSpec((p, src_h, src_w), lambda b: (b, 0, 0))],
            out_specs=pl.BlockSpec((p, out_h, out_w), lambda b: (b, 0, 0)),
            compiler_params=pltpu.CompilerParams(
                dimension_semantics=("parallel",), **compiler_kwargs),
        )(x)
    else:
        # -------- Path B: large planes, row-tiled. --------
        tile_h = _choose_row_tile(src_h, src_w, out_w, inputs.dtype, max_block_bytes)
        n_in_row_blocks = pl.cdiv(src_h, tile_h)
        kernel = functools.partial(
            _pad_rows_kernel,
            src_h=src_h, src_w=src_w, out_w=out_w, tile_h=tile_h,
            pad_value=img_pad_value,
        )
        out = pl.pallas_call(
            kernel,
            out_shape=jax.ShapeDtypeStruct((n_planes, out_h, out_w), inputs.dtype),
            grid=(n_planes, pl.cdiv(out_h, tile_h)),
            in_specs=[pl.BlockSpec(
                (1, tile_h, src_w),
                lambda b, r: (b, jnp.minimum(r, n_in_row_blocks - 1), 0))],
            out_specs=pl.BlockSpec((1, tile_h, out_w), lambda b, r: (b, r, 0)),
            compiler_params=pltpu.CompilerParams(
                dimension_semantics=("parallel", "parallel"), **compiler_kwargs),
        )(x)

    return out.reshape(n, c, out_h, out_w)


if __name__ == "__main__":
    key = jax.random.PRNGKey(0)

    # Case 1: NCHW batch, pad both height and width (path A).
    N, C, H, W = 2, 4, 16, 16
    size = (24, 32)
    x = jax.random.normal(key, (N, C, H, W), dtype=jnp.float32)

    out = batch_fixed_size_pad(x, size, img_pad_value=0)
    out = jax.block_until_ready(out)
    ref = jnp.pad(
        x, ((0, 0), (0, 0), (0, size[0] - H), (0, size[1] - W)),
        mode="constant", constant_values=0)
    assert out.shape == (N, C, 24, 32), out.shape
    assert jnp.allclose(out, ref), "mismatch vs reference padding (case 1)"

    # Case 2: early-return (no-pad) branch.
    out_same = batch_fixed_size_pad(x, (8, 8), img_pad_value=0)
    out_same = jax.block_until_ready(out_same)
    assert out_same.shape == x.shape
    assert jnp.array_equal(out_same, x)

    # Case 3: uneven plane count (partial last grid block, path A) and a
    # non-zero pad value.
    x2 = jax.random.normal(jax.random.PRNGKey(0), (1, 3, 16, 20), dtype=jnp.float32)
    size2 = (24, 24)
    out2 = batch_fixed_size_pad(x2, size2, img_pad_value=1)
    out2 = jax.block_until_ready(out2)
    ref2 = jnp.pad(
        x2, ((0, 0), (0, 0), (0, size2[0] - 16), (0, size2[1] - 20)),
        mode="constant", constant_values=1)
    assert out2.shape == (1, 3, 24, 24), out2.shape
    assert jnp.allclose(out2, ref2), "mismatch vs reference padding (case 3)"

    # Case 4: force the row-tiled large-plane path (path B), with a src_h that
    # is not a multiple of the row tile so the boundary-straddling block and
    # the clamped input index map are exercised.
    x3 = jax.random.normal(jax.random.PRNGKey(0), (1, 2, 28, 40), dtype=jnp.float32)
    size3 = (48, 64)
    out3 = batch_fixed_size_pad(x3, size3, img_pad_value=3, max_block_bytes=4096)
    out3 = jax.block_until_ready(out3)
    ref3 = jnp.pad(
        x3, ((0, 0), (0, 0), (0, size3[0] - 28), (0, size3[1] - 40)),
        mode="constant", constant_values=3)
    assert out3.shape == (1, 2, 48, 64), out3.shape
    assert jnp.allclose(out3, ref3), "mismatch vs reference padding (case 4)"

    print("KERNEL_OK")
</pallas_src>

<mosaic_0001>
module attributes {stable_mosaic.version = 11 : i64} {
  func.func @_pad_planes_kernel(%arg0: i32, %arg1: memref<4x16x16xf32, #tpu.memory_space<vmem>>, %arg2: memref<4x24x32xf32, #tpu.memory_space<vmem>>) attributes {dimension_semantics = [#tpu.dimension_semantics<parallel>], iteration_bounds = array<i64: 2>, scalar_prefetch = 0 : i64, scratch_operands = 0 : i64, tpu.core_type = #tpu.core_type<tc>, window_params = [{transform_indices = @transform_0, window_bounds = array<i64: 4, 16, 16>}, {transform_indices = @transform_1, window_bounds = array<i64: 4, 24, 32>}]} {
    %c0 = arith.constant 0 : index
    %c0_0 = arith.constant 0 : index
    %c0_1 = arith.constant 0 : index
    %0 = vector.load %arg1[%c0, %c0_0, %c0_1] : memref<4x16x16xf32, #tpu.memory_space<vmem>>, vector<4x16x16xf32>
    %c0_2 = arith.constant 0 : index
    %c0_3 = arith.constant 0 : index
    %c0_4 = arith.constant 0 : index
    %1 = vector.load %arg2[%c0_2, %c0_3, %c0_4] : memref<4x24x32xf32, #tpu.memory_space<vmem>>, vector<4x16x16xf32>
    tpu.vector_store %arg2[%c0_2, %c0_3, %c0_4], %0 {strides = array<i32>} : memref<4x24x32xf32, #tpu.memory_space<vmem>>, vector<4x16x16xf32>,
    %cst = arith.constant 0.000000e+00 : f32
    %2 = vector.broadcast %cst : f32 to vector<4x16x16xf32>
    %c0_5 = arith.constant 0 : index
    %c0_6 = arith.constant 0 : index
    %c16 = arith.constant 16 : index
    %3 = vector.load %arg2[%c0_5, %c0_6, %c16] : memref<4x24x32xf32, #tpu.memory_space<vmem>>, vector<4x16x16xf32>
    tpu.vector_store %arg2[%c0_5, %c0_6, %c16], %2 {strides = array<i32>} : memref<4x24x32xf32, #tpu.memory_space<vmem>>, vector<4x16x16xf32>,
    %cst_7 = arith.constant 0.000000e+00 : f32
    %4 = vector.broadcast %cst_7 : f32 to vector<4x8x32xf32>
    %c0_8 = arith.constant 0 : index
    %c16_9 = arith.constant 16 : index
    %c0_10 = arith.constant 0 : index
    %5 = vector.load %arg2[%c0_8, %c16_9, %c0_10] : memref<4x24x32xf32, #tpu.memory_space<vmem>>, vector<4x8x32xf32>
    tpu.vector_store %arg2[%c0_8, %c16_9, %c0_10], %4 {strides = array<i32>} : memref<4x24x32xf32, #tpu.memory_space<vmem>>, vector<4x8x32xf32>,
    return
  }
  func.func @transform_0(%arg0: i32) -> (i32, i32, i32) {
    %c0_i32 = arith.constant 0 : i32
    %c0_i32_0 = arith.constant 0 : i32
    %c0_i32_1 = arith.constant 0 : i32
    return %arg0, %c0_i32, %c0_i32_0 : i32, i32, i32
  }
  func.func @transform_1(%arg0: i32) -> (i32, i32, i32) {
    %c0_i32 = arith.constant 0 : i32
    %c0_i32_0 = arith.constant 0 : i32
    %c0_i32_1 = arith.constant 0 : i32
    return %arg0, %c0_i32, %c0_i32_0 : i32, i32, i32
  }
}

</mosaic_0001>

<bundles_post_ra>
// kernel: tpu_custom_call.1
= control target key start
LH: loop header
LB: loop body
LE: loop exit
PB: predicated region body
PF: predicated region fallthrough
CT: control target
= control target key end

     0   :  { %6 = vsyncpa [#allocation3], 0  ;;  %s602_s0 = inlined_call_operand.hbm [shape: f32[8,16,16], index: 0, kind: input, shape index: {}]   ;;  %s603_s1 = inlined_call_operand.hbm [shape: f32[8,24,32], index: 1, kind: output, shape index: {}]  }
   0x1   :  { %8 = vsyncpa [#allocation3 + $0x1], 0 }
   0x2   :  { %9 = vsyncpa [#allocation4], 0 }
   0x3   :  { %11 = vsyncpa [#allocation4 + $0x1], 0  ;;  %s443_s6 = smov 0   ;;  %s445_s7 = smov 0  }
   0x4   :  { %s447_s8 = smov 0   ;;  %s449_s9 = smov 0  }
   0x5 LB: > { %s464_s10 = sadd.s32 4294967295, %s426_s9   ;;  %s261_s11 = sadd.s32 4294967294, %s426_s9   ;;  %s426_s9 = sphi %s449_s9, %s613_s9   ;;  %s422_s8 = sphi %s447_s8, %s612_s8   ;;  %s418_s7 = sphi %s445_s7, %s611_s7   ;;  %s414_s6 = sphi %s443_s6, %s610_s6  }
   0x6   : > { %s468_s12 = sadd.s32 1, %s426_s9   ;;  %s24_s13 = sadd.s32 1, %s422_s8 }
   0x7   : > { %s21_s14 = ssub.s32 %s426_s9, %s468_s12  ;;  %p31_p0 = scmp.ne.s32.totalorder %s422_s8, %s418_s7 }
   0x8   : > { %p22_p1 = scmp.eq.s32.totalorder %s21_s14, 0  ;;  %p32_p2 = scmp.eq.s32.totalorder %s426_s9, 0 }
   0x9   : > { %p37_p3 = scmp.ne.s32.totalorder %s418_s7, %s414_s6  ;;  %p38_p4 = scmp.eq.s32.totalorder %s464_s10, 0 }
   0xa   : > { %s480_s15 = scalar_select %p22_p1, %s422_s8, %s24_s13  }
   0xb   : > { %p482_p5 = por %p32_p2, %p31_p0  ;;  %p486_p6 = por %p38_p4, %p37_p3 }
   0xc   : > { %p61_p7 = scmp.eq.s32.totalorder %s464_s10, 1  ;;  %p67_p8 = scmp.eq.s32.totalorder %s261_s11, 1 }
   0xd   : > { %p291_p10 = scmp.lt.s32.totalorder %s426_s9, 2  ;;  %s87_s20 = sand.u32 1, %s422_s8  }
   0xe   : > { %p493_p11 = por %p61_p7, %p31_p0  ;;  %p497_p12 = por %p67_p8, %p37_p3 }
   0xf   : > { %s276_s21 = sshll.u32 %s426_s9, 6  ;;  %s264_s22 = sshll.u32 %s87_s20, 6 }
  0x10   : > { %s97_s25 = scalar_lea.hbm %s602_s0, %s276_s21  ;;  %s91_s27 = scalar_lea.vmem [#allocation2], %s264_s22 }
  0x11   : > { %s98_s26 = sshll.u32 %s97_s25, 4  ;;  %s100_s28 = sshll.u32 %s91_s27, 4  ;;  %s99_s26 = int_to_ptr.hbm [resolvable:$true] %s98_s26  ;;  %s101_s28 = int_to_ptr.vmem [resolvable:$true] %s100_s28 }
  0x12   : > { %p508_p13 = pnand %p291_p10, %p482_p5  ;;  %p268_p0 = scmp.ge.s32.totalorder %s426_s9, 1 }
  0x13   : > { %p108_p1 = scmp.lt.s32.totalorder %s426_s9, 3  ;;  %s88_s30 = scalar_lea.sflag [#allocation3], %s87_s20 }
  0x14   : > { %s330_s2 = sshra.s32 %s99_s26, 4  ;;  %p334_p3 = pneg %p508_p13  ;;  %s331_s2 = int_to_ptr.hbm [resolvable:$true] %s330_s2 }
  0x15   : > { %s332_s3 = scalar_lea.hbm %s331_s2, 64  ;;  %s337_s11 = scalar_lea.hbm %s602_s0, 128 }
  0x16   : > { %p333_p2 = scmp.ne.s32.totalorder %s331_s2, %s332_s3  ;;  %p338_p5 = scmp.lt.s32.totalorder %s331_s2, %s602_s0 }
  0x17   : > { %p339_p8 = scmp.lt.s32.totalorder %s337_s11, %s332_s3 }
  0x18   : > { %p335_p4 = pnand %p334_p3, %p333_p2 }
  0x19   : > { %p340_p10 = por %p339_p8, %p338_p5 }
  0x1a   : > { %p336_p7 = pneg %p335_p4 }
  0x1c   : > { %p341_p9 = pnand %p340_p10, %p336_p7 }
  0x1e   : > { %344 = shalt.err (!%p341_p9)
}
  0x1f   : > { %s428_s16 = smov 128   ;;  %s429_s20 = smov 8  }
  0x20   : > { %286 = dma.hbm_to_vmem [thread:$0]  (!%p508_p13), %s99_s26, 1024, %s101_s28, %s88_s30, %s428_s16, %s428_s16, %s429_s20  }
  0x21   : > { %p109_p2 = pnand %p268_p0, %p108_p1 }
  0x22   : > { %s529_s21 = sand.u32 (!%p109_p2), 1, %s418_s7  }
  0x23   : > { %112 = sbr.rel (%p109_p2) target bundleno = 67 (0x43), region = 24  ;;  %s269_s22 = sshll.u32 (!%p109_p2), %s529_s21, 6 }
  0x24   : > { %s115_s23 = scalar_lea.sflag (!%p109_p2), [#allocation3], %s529_s21  ;;  %s118_s24 = scalar_lea.vmem (!%p109_p2), [#allocation2], %s269_s22 }
  0x28   : > { %405 = dma.done.wait (%p486_p6), %s115_s23, 1024  }
  0x29   : > { %407 = vsyncadd (%p486_p6), %s115_s23, 4294966272  ;;  %s277_s25 = smul.u32 96, %s529_s21  ;;  %vm166_vm0 = vcmask 261120   ;;  %v430_v0 = vmov 0.0   ;;  %vm148_vm1 = vcmask 130048   ;;  %v140_v1 = vld [vmem:[%s118_s24] sm:$0xff] }
  0x2a   : > { %v141_v2 = vld [vmem:[%s118_s24 + $0x8] sm:$0xff]  ;;  %v142_v3 = vld [vmem:[%s118_s24 + $0x10] sm:$0xff]  ;;  %v143_v4 = vld [vmem:[%s118_s24 + $0x18] sm:$0xff]  ;;  %s278_s17 = smul.u32 96, %s464_s10  ;;  %vm157_vm2 = vcmask 261248   ;;  %s172_s2 = scalar_lea.sflag [#allocation4], %s529_s21 }
  0x2b   : > { %s538_s26 = scalar_lea.vmem [#allocation5], %s277_s25  ;;  %v144_v5 = vld [vmem:[%s118_s24 + $0x20] sm:$0xff]  ;;  %v145_v6 = vld [vmem:[%s118_s24 + $0x28] sm:$0xff]  ;;  %v146_v7 = vld [vmem:[%s118_s24 + $0x30] sm:$0xff]  ;;  %s380_s13 = scalar_lea.hbm %s603_s1, 192 }
  0x2c   : > { %167 = vst.msk [vmem:[%s538_s26 + $0x10] sm:$0xff] %vm166_vm0, %v430_v0  ;;  %v147_v8 = vld [vmem:[%s118_s24 + $0x38] sm:$0xff]  ;;  %s184_s29 = scalar_lea.hbm %s603_s1, %s278_s17  ;;  %s185_s10 = sshll.u32 %s538_s26, 4  ;;  %s186_s10 = int_to_ptr.vmem [resolvable:$true] %s185_s10 }
  0x2d   : > { %168 = vst.msk [vmem:[%s538_s26 + $0x28] sm:$0xff] %vm166_vm0, %v430_v0  ;;  %s187_s30 = sshll.u32 %s184_s29, 4  ;;  %s188_s30 = int_to_ptr.hbm [resolvable:$true] %s187_s30 }
  0x2e   : > { %169 = vst.msk [vmem:[%s538_s26 + $0x40] sm:$0xff] %vm166_vm0, %v430_v0  ;;  %s374_s3 = sshra.s32 %s188_s30, 4  ;;  %s375_s3 = int_to_ptr.hbm [resolvable:$true] %s374_s3 }
  0x2f   : > { %170 = vst.msk [vmem:[%s538_s26 + $0x58] sm:$0xff] %vm166_vm0, %v430_v0  ;;  %s376_s4 = scalar_lea.hbm %s375_s3, 96  ;;  %p381_p0 = scmp.lt.s32.totalorder %s375_s3, %s603_s1 }
  0x30   : > { %149 = vst.msk [vmem:[%s538_s26] sm:$0xff] %vm148_vm1, %v140_v1  ;;  %p377_p6 = scmp.ne.s32.totalorder %s375_s3, %s376_s4  ;;  %p382_p1 = scmp.lt.s32.totalorder %s380_s13, %s376_s4 }
  0x31   : > { %150 = vst.msk [vmem:[%s538_s26 + $0x8] sm:$0xff] %vm148_vm1, %v141_v2 }
  0x32   : > { %151 = vst.msk [vmem:[%s538_s26 + $0x18] sm:$0xff] %vm148_vm1, %v142_v3  ;;  %p378_p9 = pnand %p377_p6, %p493_p11  ;;  %p383_p3 = por %p382_p1, %p381_p0 }
  0x33   : > { %152 = vst.msk [vmem:[%s538_s26 + $0x20] sm:$0xff] %vm148_vm1, %v143_v4 }
  0x34   : > { %153 = vst.msk [vmem:[%s538_s26 + $0x30] sm:$0xff] %vm148_vm1, %v144_v5  ;;  %p379_p13 = pneg %p378_p9 }
  0x35   : > { %154 = vst.msk [vmem:[%s538_s26 + $0x38] sm:$0xff] %vm148_vm1, %v145_v6 }
  0x36   : > { %155 = vst.msk [vmem:[%s538_s26 + $0x48] sm:$0xff] %vm148_vm1, %v146_v7  ;;  %p384_p4 = pnand %p383_p3, %p379_p13 }
  0x37   : > { %156 = vst.msk [vmem:[%s538_s26 + $0x50] sm:$0xff] %vm148_vm1, %v147_v8 }
  0x38   : > { %158 = vst.msk [vmem:[%s538_s26] sm:$0xff] %vm157_vm2, %v430_v0 }
  0x39   : > { %159 = vst.msk [vmem:[%s538_s26 + $0x8] sm:$0xff] %vm157_vm2, %v430_v0 }
  0x3a   : > { %160 = vst.msk [vmem:[%s538_s26 + $0x18] sm:$0xff] %vm157_vm2, %v430_v0 }
  0x3b   : > { %161 = vst.msk [vmem:[%s538_s26 + $0x20] sm:$0xff] %vm157_vm2, %v430_v0 }
  0x3c   : > { %162 = vst.msk [vmem:[%s538_s26 + $0x30] sm:$0xff] %vm157_vm2, %v430_v0 }
  0x3d   : > { %163 = vst.msk [vmem:[%s538_s26 + $0x38] sm:$0xff] %vm157_vm2, %v430_v0 }
  0x3e   : > { %164 = vst.msk [vmem:[%s538_s26 + $0x48] sm:$0xff] %vm157_vm2, %v430_v0 }
  0x3f   : > { %165 = vst.msk [vmem:[%s538_s26 + $0x50] sm:$0xff] %vm157_vm2, %v430_v0 }
  0x40   : > { %387 = shalt.err (!%p384_p4)
}
  0x41   : > { %s431_s20 = smov 128   ;;  %s432_s21 = smov 8  }
  0x42   : > { %281 = dma.vmem_to_hbm [thread:$0]  (%p493_p11), %s186_s10, 1536, %s188_s30, %s172_s2, %s431_s20, %s431_s20, %s432_s21  }
  0x43 PF: > { %s202_s22 = sand.u32 1, %s414_s6   ;;  %p609_p7 = scmp.ge.s32.totalorder %s426_s9, 2 }
  0x44   : > { %s203_s23 = scalar_lea.sflag [#allocation4], %s202_s22 }
  0x45   : > { %p288_p5 = pnand %p609_p7, %p497_p12 }
  0x47   : > { %p289_p8 = pneg %p288_p5 }
  0x49   : > { %409 = dma.done.wait (%p289_p8), %s203_s23, 1536  }
  0x4a   : > { %411 = vsyncadd (%p289_p8), %s203_s23, 4294965760  ;;  %p14_p10 = scmp.ge.s32.totalorder %s468_s12, 4   ;;  %s610_s6 = smov %s418_s7 }
  0x4b   : > { %s611_s7 = smov %s422_s8  ;;  %s612_s8 = smov %s480_s15 }
  0x4c   : > { %s613_s9 = smov %s468_s12  ;;  %16 = sbr.rel (!%p14_p10) target bundleno = 5 (0x5), region = 69 }
  0x51   :  { %209 = vsyncpa [#allocation3], 1 }
  0x52   :  { %211 = vsyncpa [#allocation3 + $0x1], 1 }
  0x53   :  { %212 = vsyncpa [#allocation4], 1 }
  0x54   :  { %214 = vsyncpa [#allocation4 + $0x1], 1 }

</bundles_post_ra>
